<compile_context>
chip_gen: v7x
topology: tpu7x:2x2x1
jax: 0.10.0
libtpu: 0.0.40
codegen_flags: <defaults>
</compile_context>

<pallas_src>
import functools

import jax
import jax.numpy as jnp
from jax.experimental import pallas as pl
from jax.experimental.pallas import tpu as pltpu


def _ln_withbias_kernel(x_ref, w_ref, b_ref, o_ref, *, eps: float):
    x = x_ref[...].astype(jnp.float32)        # (Bb, C, tn)
    w = w_ref[...].astype(jnp.float32)        # (1, C, 1)
    b = b_ref[...].astype(jnp.float32)        # (1, C, 1)
    mu = jnp.mean(x, axis=1, keepdims=True)   # (Bb, 1, tn) sublane reduce
    xc = x - mu
    var = jnp.mean(xc * xc, axis=1, keepdims=True)
    y = xc * jax.lax.rsqrt(var + eps)
    o_ref[...] = (y * w + b).astype(o_ref.dtype)


def _ln_biasfree_kernel(x_ref, w_ref, o_ref, *, eps: float):
    x = x_ref[...].astype(jnp.float32)        # (Bb, C, tn)
    w = w_ref[...].astype(jnp.float32)        # (1, C, 1)
    # BiasFree: variance is computed around the mean, but the mean is NOT
    # subtracted from x in the output (matches torch.var(unbiased=False)).
    mu = jnp.mean(x, axis=1, keepdims=True)
    xc = x - mu
    var = jnp.mean(xc * xc, axis=1, keepdims=True)
    o_ref[...] = (x * jax.lax.rsqrt(var + eps) * w).astype(o_ref.dtype)


def _vmem_budget_and_limit():
    """Pick (footprint budget, scoped-VMEM limit) per TPU generation.

    v5e/v6e: 128 MiB physical VMEM -> request 48 MiB scoped, budget ~40 MiB.
    v7x:      64 MiB physical VMEB -> request 32 MiB scoped, budget ~24 MiB.
    Unknown:  assume the smallest (64 MiB) so the request is safe everywhere.
    """
    phys = None
    try:
        info = pltpu.get_tpu_info()
        for name in ("vmem_capacity_bytes", "vmem_bytes", "vmem_size_bytes"):
            v = getattr(info, name, None)
            if v:
                phys = int(v)
                break
    except Exception:
        phys = None
    if not phys:
        phys = 64 << 20
    limit = min(phys // 2, 48 << 20)
    budget = max(limit - (8 << 20), limit // 2)
    return budget, limit


def _choose_tiles(B, C, HW, itemsize, budget_bytes, *,
                  min_steps=8, min_block_bytes=1 << 20):
    """Choose (batch sub-block Bb, lane tile tn) for blocks of shape (Bb,C,tn).

    VMEM accounting per (batch-row x lane) column:
      2-in + 2-out pipeline buffers at SUBLANE-PADDED C in the native dtype,
      plus ~4 f32 temporaries (x, centered, squared, scaled) at padded C.
    """
    sub = {4: 8, 2: 16, 1: 32}.get(itemsize, 8)
    c_pad = ((C + sub - 1) // sub) * sub
    per_col = c_pad * (4 * itemsize + 4 * 4)
    max_cols = max(128, budget_bytes // per_col)

    # Keep the grid from collapsing on big tensors (feeds both v7x TCs and the
    # 2-deep pipeline), but never shrink blocks below ~1 MiB of input bytes.
    total_cols = B * HW
    in_bytes_per_col = max(C * itemsize, 1)
    cols_for_steps = -(-total_cols // min_steps)
    cols_floor = max(128, min_block_bytes // in_bytes_per_col)
    cols_cap = max(128, min(max_cols, max(cols_for_steps, cols_floor)))

    hw_pad = ((HW + 127) // 128) * 128
    if HW <= 128:
        tn = HW
    else:
        tn = max(128, min((cols_cap // 128) * 128, hw_pad))
    bb = max(1, min(B, cols_cap // max(tn, 1)))
    return bb, tn


def layernorm_pallas(x_nchw, weight, bias=None, *, layer_norm_type="WithBias",
                     eps=1e-5):
    """LayerNorm over channels of an NCHW tensor (FARM-style)."""
    with_bias = layer_norm_type != "BiasFree"
    B, C, H, W = x_nchw.shape
    assert weight.shape == (C,)
    HW = H * W
    itemsize = jnp.dtype(x_nchw.dtype).itemsize

    # Free reshapes only — no transposes, no padding copies.
    x3 = x_nchw.reshape(B, C, HW)
    w3 = weight.reshape(1, C, 1)

    budget, vmem_limit = _vmem_budget_and_limit()
    bb, tn = _choose_tiles(B, C, HW, itemsize, budget)
    grid = (pl.cdiv(B, bb), pl.cdiv(HW, tn))

    x_spec = pl.BlockSpec((bb, C, tn), lambda bi, j: (bi, 0, j))
    p_spec = pl.BlockSpec((1, C, 1), lambda bi, j: (0, 0, 0))
    o_spec = pl.BlockSpec((bb, C, tn), lambda bi, j: (bi, 0, j))

    if with_bias:
        if bias is None:
            bias = jnp.zeros((C,), dtype=weight.dtype)
        kernel = functools.partial(_ln_withbias_kernel, eps=eps)
        in_specs = [x_spec, p_spec, p_spec]
        args = (x3, w3, bias.reshape(1, C, 1))
        n_params = 2
    else:
        # Specialized: no bias input at all (no dead DMA / load).
        kernel = functools.partial(_ln_biasfree_kernel, eps=eps)
        in_specs = [x_spec, p_spec]
        args = (x3, w3)
        n_params = 1

    n_elems = B * C * HW
    cost = pl.CostEstimate(
        flops=8 * n_elems,
        transcendentals=B * HW,
        bytes_accessed=(2 * n_elems * itemsize
                        + n_params * C * jnp.dtype(weight.dtype).itemsize),
    )

    out3 = pl.pallas_call(
        kernel,
        out_shape=jax.ShapeDtypeStruct((B, C, HW), x_nchw.dtype),
        grid_spec=pltpu.PrefetchScalarGridSpec(
            num_scalar_prefetch=0,
            grid=grid,
            in_specs=in_specs,
            out_specs=o_spec,
        ),
        compiler_params=pltpu.CompilerParams(
            dimension_semantics=("parallel", "parallel"),
            vmem_limit_bytes=vmem_limit,
        ),
        cost_estimate=cost,
    )(*args)

    return out3.reshape(B, C, H, W)


def _reference(x_nchw, weight, bias, layer_norm_type="WithBias", eps=1e-5):
    B, C, H, W = x_nchw.shape
    x3 = jnp.transpose(x_nchw, (0, 2, 3, 1)).reshape(B, H * W, C).astype(jnp.float32)
    mu = jnp.mean(x3, axis=-1, keepdims=True)
    var = jnp.mean((x3 - mu) ** 2, axis=-1, keepdims=True)
    if layer_norm_type == "BiasFree":
        y = x3 / jnp.sqrt(var + eps) * weight
    else:
        y = (x3 - mu) / jnp.sqrt(var + eps) * weight + bias
    return jnp.transpose(y.reshape(B, H, W, C), (0, 3, 1, 2)).astype(x_nchw.dtype)


if __name__ == "__main__":
    key = jax.random.PRNGKey(0)
    B, C, H, W = 2, 4, 16, 16
    x = jax.random.normal(key, (B, C, H, W), dtype=jnp.float32)

    # Deterministic parameter init, matching nn.Parameter(torch.ones/zeros(dim)).
    weight = jnp.ones((C,), dtype=jnp.float32)
    bias = jnp.zeros((C,), dtype=jnp.float32)

    out = layernorm_pallas(x, weight, bias, layer_norm_type="WithBias")
    out = jax.block_until_ready(out)
    ref = _reference(x, weight, bias, layer_norm_type="WithBias")
    assert out.shape == (B, C, H, W)
    assert jnp.allclose(out, ref, atol=1e-5, rtol=1e-5)

    # BiasFree branch (specialized 2-input pallas_call).
    out_bf = jax.block_until_ready(
        layernorm_pallas(x, weight, None, layer_norm_type="BiasFree"))
    ref_bf = _reference(x, weight, bias, layer_norm_type="BiasFree")
    assert jnp.allclose(out_bf, ref_bf, atol=1e-5, rtol=1e-5)

    # Non-divisible spatial size exercises the partial-last-block path (no pad).
    x2 = jax.random.normal(jax.random.PRNGKey(1), (2, 4, 10, 13), dtype=jnp.float32)
    out2 = jax.block_until_ready(
        layernorm_pallas(x2, weight, bias, layer_norm_type="WithBias"))
    ref2 = _reference(x2, weight, bias, layer_norm_type="WithBias")
    assert jnp.allclose(out2, ref2, atol=1e-5, rtol=1e-5)

    print("KERNEL_OK")
</pallas_src>

<mosaic_0001>
module attributes {stable_mosaic.version = 11 : i64} {
  func.func @_ln_withbias_kernel(%arg0: i32, %arg1: i32, %arg2: memref<2x4x256xf32, #tpu.memory_space<vmem>>, %arg3: memref<1x4x1xf32, #tpu.memory_space<vmem>>, %arg4: memref<1x4x1xf32, #tpu.memory_space<vmem>>, %arg5: memref<2x4x256xf32, #tpu.memory_space<vmem>>) attributes {dimension_semantics = [#tpu.dimension_semantics<parallel>, #tpu.dimension_semantics<parallel>], iteration_bounds = array<i64: 1, 1>, scalar_prefetch = 0 : i64, scratch_operands = 0 : i64, tpu.core_type = #tpu.core_type<tc>, window_params = [{transform_indices = @transform_0, window_bounds = array<i64: 2, 4, 256>}, {pipeline_mode = #tpu.pipeline_mode<synchronous>, transform_indices = @transform_1, window_bounds = array<i64: 1, 4, 1>}, {pipeline_mode = #tpu.pipeline_mode<synchronous>, transform_indices = @transform_2, window_bounds = array<i64: 1, 4, 1>}, {transform_indices = @transform_3, window_bounds = array<i64: 2, 4, 256>}]} {
    %c0 = arith.constant 0 : index
    %c0_0 = arith.constant 0 : index
    %c0_1 = arith.constant 0 : index
    %0 = vector.load %arg2[%c0, %c0_0, %c0_1] : memref<2x4x256xf32, #tpu.memory_space<vmem>>, vector<2x4x256xf32>
    %c0_2 = arith.constant 0 : index
    %c0_3 = arith.constant 0 : index
    %c0_4 = arith.constant 0 : index
    %1 = vector.load %arg3[%c0_2, %c0_3, %c0_4] : memref<1x4x1xf32, #tpu.memory_space<vmem>>, vector<1x4x1xf32>
    %c0_5 = arith.constant 0 : index
    %c0_6 = arith.constant 0 : index
    %c0_7 = arith.constant 0 : index
    %2 = vector.load %arg4[%c0_5, %c0_6, %c0_7] : memref<1x4x1xf32, #tpu.memory_space<vmem>>, vector<1x4x1xf32>
    %cst = arith.constant dense<0.000000e+00> : vector<2x256xf32>
    %3 = vector.multi_reduction <add>, %0, %cst [1] : vector<2x4x256xf32> to vector<2x256xf32>
    %4 = vector.shape_cast %3 : vector<2x256xf32> to vector<2x1x256xf32>
    %cst_8 = arith.constant 4.000000e+00 : f32
    %5 = vector.broadcast %cst_8 : f32 to vector<2x1x256xf32>
    %6 = arith.divf %4, %5 : vector<2x1x256xf32>
    %7 = vector.broadcast %6 : vector<2x1x256xf32> to vector<2x4x256xf32>
    %8 = arith.subf %0, %7 : vector<2x4x256xf32>
    %9 = arith.mulf %8, %8 : vector<2x4x256xf32>
    %cst_9 = arith.constant dense<0.000000e+00> : vector<2x256xf32>
    %10 = vector.multi_reduction <add>, %9, %cst_9 [1] : vector<2x4x256xf32> to vector<2x256xf32>
    %11 = vector.shape_cast %10 : vector<2x256xf32> to vector<2x1x256xf32>
    %cst_10 = arith.constant 4.000000e+00 : f32
    %12 = vector.broadcast %cst_10 : f32 to vector<2x1x256xf32>
    %13 = arith.divf %11, %12 : vector<2x1x256xf32>
    %cst_11 = arith.constant 9.99999974E-6 : f32
    %14 = vector.broadcast %cst_11 : f32 to vector<2x1x256xf32>
    %15 = arith.addf %13, %14 : vector<2x1x256xf32>
    %16 = math.rsqrt %15 : vector<2x1x256xf32>
    %17 = vector.broadcast %16 : vector<2x1x256xf32> to vector<2x4x256xf32>
    %18 = arith.mulf %8, %17 : vector<2x4x256xf32>
    %19 = vector.broadcast %1 : vector<1x4x1xf32> to vector<2x4x256xf32>
    %20 = arith.mulf %18, %19 : vector<2x4x256xf32>
    %21 = vector.broadcast %2 : vector<1x4x1xf32> to vector<2x4x256xf32>
    %22 = arith.addf %20, %21 : vector<2x4x256xf32>
    %c0_12 = arith.constant 0 : index
    %c0_13 = arith.constant 0 : index
    %c0_14 = arith.constant 0 : index
    %23 = vector.load %arg5[%c0_12, %c0_13, %c0_14] : memref<2x4x256xf32, #tpu.memory_space<vmem>>, vector<2x4x256xf32>
    tpu.vector_store %arg5[%c0_12, %c0_13, %c0_14], %22 {strides = array<i32>} : memref<2x4x256xf32, #tpu.memory_space<vmem>>, vector<2x4x256xf32>,
    return
  }
  func.func @transform_0(%arg0: i32, %arg1: i32) -> (i32, i32, i32) {
    %c0_i32 = arith.constant 0 : i32
    %c0_i32_0 = arith.constant 0 : i32
    return %arg0, %c0_i32, %arg1 : i32, i32, i32
  }
  func.func @transform_1(%arg0: i32, %arg1: i32) -> (i32, i32, i32) {
    %c0_i32 = arith.constant 0 : i32
    %c0_i32_0 = arith.constant 0 : i32
    %c0_i32_1 = arith.constant 0 : i32
    %c0_i32_2 = arith.constant 0 : i32
    return %c0_i32, %c0_i32_0, %c0_i32_1 : i32, i32, i32
  }
  func.func @transform_2(%arg0: i32, %arg1: i32) -> (i32, i32, i32) {
    %c0_i32 = arith.constant 0 : i32
    %c0_i32_0 = arith.constant 0 : i32
    %c0_i32_1 = arith.constant 0 : i32
    %c0_i32_2 = arith.constant 0 : i32
    return %c0_i32, %c0_i32_0, %c0_i32_1 : i32, i32, i32
  }
  func.func @transform_3(%arg0: i32, %arg1: i32) -> (i32, i32, i32) {
    %c0_i32 = arith.constant 0 : i32
    %c0_i32_0 = arith.constant 0 : i32
    return %arg0, %c0_i32, %arg1 : i32, i32, i32
  }
}

</mosaic_0001>

<bundles_post_ra>
// kernel: tpu_custom_call.1
= control target key start
LH: loop header
LB: loop body
LE: loop exit
PB: predicated region body
PF: predicated region fallthrough
CT: control target
= control target key end

     0   :  { %8 = vsyncpa [#allocation3], 0  ;;  %s323_s0 = inlined_call_operand.hbm [shape: f32[2,4,256], index: 0, kind: input, shape index: {}]   ;;  %s324_s1 = inlined_call_operand.vmem [shape: f32[1,4,1], index: 1, kind: input, shape index: {}]   ;;  %s325_s2 = inlined_call_operand.vmem [shape: f32[1,4,1], index: 2, kind: input, shape index: {}]   ;;  %s326_s3 = inlined_call_operand.hbm [shape: f32[2,4,256], index: 3, kind: output, shape index: {}]  }
   0x1   :  { %9 = vsyncpa [#allocation4], 0  ;;  %s253_s12 = smov [#allocation2]   ;;  %s205_s16 = scalar_lea.hbm %s323_s0, 256 }
   0x2   :  { %s15_s13 = sshll.u32 %s253_s12, 4  ;;  %p206_p0 = scmp.ne.s32.totalorder %s323_s0, %s205_s16  ;;  %s16_s13 = int_to_ptr.vmem [resolvable:$true] %s15_s13 }
   0x3   :  { %p209_p1 = scmp.lt.u32.totalorder %s205_s16, %s323_s0 }
   0x5   :  { %p211_p2 = pnand %p209_p1, %p206_p0 }
   0x7   :  { %214 = shalt.err (!%p211_p2)
}
   0x8   :  { %s215_s21 = scalar_lea.vmem %s16_s13, 256  ;;  %p220_p4 = scmp.lt.s32.totalorder %s16_s13, %s16_s13 }
   0x9   :  { %p216_p3 = scmp.ne.s32.totalorder %s16_s13, %s215_s21  ;;  %p221_p5 = scmp.lt.s32.totalorder %s215_s21, %s215_s21 }
   0xb   :  { %p222_p6 = por %p221_p5, %p220_p4 }
   0xd   :  { %p223_p7 = pnand %p222_p6, %p216_p3 }
   0xf   :  { %226 = shalt.err (!%p223_p7)
}
  0x10   :  { %s254_s22 = smov 128   ;;  %s255_s23 = smov 8  }
  0x11   :  { %21 = dma.hbm_to_vmem [thread:$0]  %s323_s0, 256, %s16_s13, [#allocation3], %s254_s22, %s254_s22, %s255_s23  }
  0x12   :  { %249 = dma.done.wait [#allocation3], 256  }
  0x13   :  { %250 = vsyncadd [#allocation3], 4294967040  ;;  %v256_v0 = vmov 0   ;;  %v31_v1 = vld [vmem:[%s324_s1] sm:$0xf]  ;;  %v30_v4 = vld [vmem:[#allocation2 + $0x8] sm:$0xff] }
  0x14   :  { %194 = vset.pattern.permute.xlu0 %v256_v0  ;;  %v32_v2 = vld [vmem:[%s325_s2] sm:$0xf]  ;;  %vm39_vm0 = vcmask 1043456   ;;  %v36_v6 = vcombine.high %v30_v4, %v30_v4  ;;  %s258_s0 = smov [#allocation5]  }
  0x15   :  { %143 = vperm.xlu0 %194, %v31_v1   ;;  %v29_v3 = vld [vmem:[#allocation2] sm:$0xff]  ;;  %v54_v9 = vsel %vm39_vm0, %v30_v4, 0.0  ;;  %s176_s1 = sshll.u32 %s258_s0, 4  ;;  %s177_s1 = int_to_ptr.vmem [resolvable:$true] %s176_s1 }
  0x16   :  { %v35_v5 = vcombine.high %v29_v3, %v29_v3  ;;  %v40_v7 = vsel %vm39_vm0, %v29_v3, 0.0  ;;  %v61_v10 = vsel %vm39_vm0, %v36_v6, 0.0  ;;  %v55_v13 = vrot.slane %v54_v9, 4  ;;  %s227_s2 = scalar_lea.vmem %s177_s1, 256  ;;  %p232_p9 = scmp.lt.s32.totalorder %s177_s1, %s177_s1 }
  0x17   :  { %v41_v11 = vrot.slane %v40_v7, 4  ;;  %v62_v14 = vrot.slane %v61_v10, 4  ;;  %p228_p8 = scmp.ne.s32.totalorder %s177_s1, %s227_s2  ;;  %p233_p10 = scmp.lt.s32.totalorder %s227_s2, %s227_s2 }
  0x18   :  { %v47_v8 = vsel %vm39_vm0, %v35_v5, 0.0  ;;  %v56_v17 = vadd.f32 %v55_v13, %v54_v9 }
  0x19   :  { %157 = vperm.xlu0 %194, %v32_v2   ;;  %v48_v12 = vrot.slane %v47_v8, 4  ;;  %v42_v15 = vadd.f32 %v41_v11, %v40_v7  ;;  %v63_v18 = vadd.f32 %v62_v14, %v61_v10  ;;  %p234_p11 = por %p233_p10, %p232_p9 }
  0x1a   :  { %v57_v21 = vrot.slane %v56_v17, 2 }
  0x1b   :  { %v49_v16 = vadd.f32 %v48_v12, %v47_v8  ;;  %v43_v19 = vrot.slane %v42_v15, 2  ;;  %v64_v22 = vrot.slane %v63_v18, 2  ;;  %p235_p12 = pnand %p234_p11, %p228_p8 }
  0x1c   :  { %v58_v25 = vadd.f32 %v57_v21, %v56_v17  ;;  %v148_v21 = vlaneseq }
  0x1d   :  { %v50_v20 = vrot.slane %v49_v16, 2  ;;  %v44_v23 = vadd.f32 %v43_v19, %v42_v15  ;;  %v65_v26 = vadd.f32 %v64_v22, %v63_v18  ;;  %v257_v19 = vmov 839922192  }
  0x1e   :  { %v59_v29 = vrot.slane %v58_v25, 1 }
  0x1f   :  { %v51_v24 = vadd.f32 %v50_v20, %v49_v16  ;;  %v45_v27 = vrot.slane %v44_v23, 1  ;;  %v66_v30 = vrot.slane %v65_v26, 1  ;;  %v146_v20 = vunpack.c.l.s4 %v257_v19 }
  0x20   :  { %v60_v33 = vadd.f32 %v59_v29, %v58_v25 }
  0x21   :  { %v52_v28 = vrot.slane %v51_v24, 1  ;;  %v46_v31 = vadd.f32 %v45_v27, %v44_v23  ;;  %v67_v34 = vadd.f32 %v66_v30, %v65_v26  ;;  %v147_v25 = vunpack.c.0.s8 %v146_v20 }
  0x22   :  { %v71_v37 = vmul.f32 0.25, %v60_v33  ;;  %v149_v26 = vshrl.u32 %v148_v21, 7 }
  0x23   :  { %v53_v32 = vadd.f32 %v52_v28, %v51_v24  ;;  %v69_v35 = vmul.f32 0.25, %v46_v31  ;;  %v72_v38 = vmul.f32 0.25, %v67_v34 }
  0x24   :  { %v150_v28 = vsub.s32 %v147_v25, %v149_v26 }
  0x25   :  { %v70_v36 = vmul.f32 0.25, %v53_v32  ;;  %v78_v40 = vcombine.low %v71_v37, %v72_v38 }
  0x27   :  { %v77_v39 = vcombine.low %v69_v35, %v70_v36  ;;  %v82_v42 = vsub.f32 %v30_v4, %v78_v40 }
  0x29   :  { %v81_v41 = vsub.f32 %v29_v3, %v77_v39  ;;  %v84_v44 = vmul.f32 %v82_v42, %v82_v42 }
  0x2b   :  { %v83_v43 = vmul.f32 %v81_v41, %v81_v41  ;;  %v88_v46 = vcombine.high %v84_v44, %v84_v44  ;;  %v105_v48 = vsel %vm39_vm0, %v84_v44, 0.0 }
  0x2c   :  { %v106_v52 = vrot.slane %v105_v48, 4 }
  0x2d   :  { %v87_v45 = vcombine.high %v83_v43, %v83_v43  ;;  %v91_v47 = vsel %vm39_vm0, %v83_v43, 0.0  ;;  %v112_v51 = vsel %vm39_vm0, %v88_v46, 0.0 }
  0x2e   :  { %v92_v50 = vrot.slane %v91_v47, 4  ;;  %v113_v54 = vrot.slane %v112_v51, 4  ;;  %v107_v56 = vadd.f32 %v106_v52, %v105_v48 }
  0x2f   :  { %v98_v49 = vsel %vm39_vm0, %v87_v45, 0.0 }
  0x30   :  { %v99_v53 = vrot.slane %v98_v49, 4  ;;  %v93_v55 = vadd.f32 %v92_v50, %v91_v47  ;;  %v114_v58 = vadd.f32 %v113_v54, %v112_v51  ;;  %v108_v60 = vrot.slane %v107_v56, 2 }
  0x32   :  { %v100_v57 = vadd.f32 %v99_v53, %v98_v49  ;;  %v94_v59 = vrot.slane %v93_v55, 2  ;;  %v115_v62 = vrot.slane %v114_v58, 2  ;;  %v109_v0 = vadd.f32 %v108_v60, %v107_v56 }
  0x34   :  { %v101_v61 = vrot.slane %v100_v57, 2  ;;  %v95_v63 = vadd.f32 %v94_v59, %v93_v55  ;;  %v116_v2 = vadd.f32 %v115_v62, %v114_v58  ;;  %v110_v4 = vrot.slane %v109_v0, 1 }
  0x36   :  { %v102_v1 = vadd.f32 %v101_v61, %v100_v57  ;;  %v96_v3 = vrot.slane %v95_v63, 1  ;;  %v117_v6 = vrot.slane %v116_v2, 1  ;;  %v111_v8 = vadd.f32 %v110_v4, %v109_v0 }
  0x38   :  { %v103_v5 = vrot.slane %v102_v1, 1  ;;  %v97_v7 = vadd.f32 %v96_v3, %v95_v63  ;;  %v118_v10 = vadd.f32 %v117_v6, %v116_v2  ;;  %v121_v12 = vmul.f32 0.25, %v111_v8 }
  0x3a   :  { %v104_v9 = vadd.f32 %v103_v5, %v102_v1  ;;  %v119_v11 = vmul.f32 0.25, %v97_v7  ;;  %v122_v14 = vmul.f32 0.25, %v118_v10  ;;  %v125_v16 = vadd.f32 1e-05, %v121_v12 }
  0x3c   :  { %v120_v13 = vmul.f32 0.25, %v104_v9  ;;  %v123_v15 = vadd.f32 1e-05, %v119_v11  ;;  %v126_v18 = vadd.f32 1e-05, %v122_v14 }
  0x3e   :  { %v124_v17 = vadd.f32 1e-05, %v120_v13  ;;  %197 = vrsqrt.f32 %v123_v15 }
  0x3f   :  { %199 = vrsqrt.f32 %v125_v16 }
  0x40   :  { %201 = vrsqrt.f32 %v124_v17 }
  0x41   :  { %203 = vrsqrt.f32 %v126_v18 }
  0x48   :  { %v198_v22 = vpop.eup %197 }
  0x49   :  { %v200_v23 = vpop.eup %199 }
  0x4a   :  { %v202_v24 = vpop.eup %201 }
  0x4b   :  { %v204_v27 = vpop.eup %203  ;;  %v135_v29 = vcombine.low %v198_v22, %v202_v24 }
  0x4c   :  { %v136_v30 = vcombine.low %v200_v23, %v204_v27 }
  0x4d   :  { %v139_v32 = vmul.f32 %v135_v29, %v81_v41 }
  0x4e   :  { %v140_v33 = vmul.f32 %v136_v30, %v82_v42 }
  0x94   :  { %v144_v31 = vpop.permute.xlu0 %143 }
  0x95   :  { %v151_v34 = vrot.slane %v144_v31, %v150_v28 }
  0x97   :  { %v153_v36 = vmul.f32 %v151_v34, %v139_v32  ;;  %v154_v37 = vmul.f32 %v151_v34, %v140_v33 }
  0x98   :  { %v158_v35 = vpop.permute.xlu0 %157 }
  0x99   :  { %v165_v38 = vrot.slane %v158_v35, %v150_v28 }
  0x9b   :  { %v167_v39 = vadd.f32 %v165_v38, %v153_v36  ;;  %v168_v40 = vadd.f32 %v165_v38, %v154_v37 }
  0x9d   :  { %169 = vst [vmem:[#allocation5] sm:$0xff] %v167_v39  ;;  %170 = vst [vmem:[#allocation5 + $0x8] sm:$0xff] %v168_v40 }
  0x9e   :  { %238 = shalt.err (!%p235_p12)
}
  0x9f   :  { %s239_s5 = scalar_lea.hbm %s326_s3, 256 }
  0xa0   :  { %p240_p13 = scmp.ne.s32.totalorder %s326_s3, %s239_s5  ;;  %p243_p0 = scmp.lt.u32.totalorder %s239_s5, %s326_s3 }
  0xa2   :  { %p245_p1 = pnand %p243_p0, %p240_p13 }
  0xa4   :  { %248 = shalt.err (!%p245_p1)
}
  0xa5   :  { %182 = dma.vmem_to_hbm [thread:$0]  %s177_s1, 256, %s326_s3, [#allocation4], %s254_s22, %s254_s22, %s255_s23  }
  0xa6   :  { %251 = dma.done.wait [#allocation4], 256  }
  0xa7   :  { %252 = vsyncadd [#allocation4], 4294967040 }
  0xa8   :  { %186 = vsyncpa [#allocation3], 1 }
  0xa9   :  { %187 = vsyncpa [#allocation4], 1 }

</bundles_post_ra>
